<compile_context>
chip_gen: v6e
topology: v6e:2x2x1
jax: 0.10.0
libtpu: 0.0.40
codegen_flags: <defaults>
</compile_context>

<pallas_src>
import jax
import jax.numpy as jnp
from jax.experimental import pallas as pl
from jax.experimental.pallas import tpu as pltpu

# ---- small, forward-consistent hyperparameters -----------------------------
AA_WINDOW = 4
N_INPUT = 4
HIDDEN_1 = 32
PADDING_1 = 3
PADDING_2 = 6
OUT_CHANNELS = 8
N_OUTPUT = 1
SEQ_LEN = 16                               # L (must be >= 2*AA_WINDOW + 1)

KERNEL_1 = 2 * PADDING_1 + 1               # 7
KERNEL_2 = 2 * PADDING_2 + 1               # 13
C_TOTAL = N_INPUT + 2 * OUT_CHANNELS       # 20
WIN = 2 * AA_WINDOW + 1                    # 9
FEAT = C_TOTAL * WIN                       # 180
SLAB = 2 * (AA_WINDOW + PADDING_2) + 1     # 21 = receptive field of the 9 centers
SLAB_FEAT = SLAB * N_INPUT                 # 84
CONV_FEAT = WIN * 2 * OUT_CHANNELS         # 144
BN_EPS = 1e-5


# ---------------------------------------------------------------------------
# Fused kernel: banded conv GEMM + ReLU -> (BN-folded) Linear + ReLU ->
#               Linear(->1) + Sigmoid, lane-dense (N_OUTPUT, BBLK) output.
# ---------------------------------------------------------------------------
def fused_kernel(x_rf_ref, wband_ref, bconv_ref, wx0_ref, wy12_ref,
                 ba_ref, wb_ref, bb_ref, out_ref):
    x_rf = x_rf_ref[...]                                            # (BBLK, 84)

    # Both Conv1d's at the 9 center positions as ONE banded GEMM; the result
    # columns are already (position, [conv1 ch | conv2 ch])-flattened.
    pre = jnp.dot(x_rf, wband_ref[...], preferred_element_type=jnp.float32)
    y12 = jnp.maximum(pre + bconv_ref[...], 0.0)                    # (BBLK, 144)

    # First Linear with eval-mode BatchNorm folded in.  The x0 pass-through
    # goes through a zero-expanded weight block (no lane concatenate).
    h = jnp.dot(y12, wy12_ref[...], preferred_element_type=jnp.float32)
    h = h + jnp.dot(x_rf, wx0_ref[...], preferred_element_type=jnp.float32)
    h = jnp.maximum(h + ba_ref[...], 0.0)                           # (BBLK, H)

    # Second Linear (N_OUTPUT=1): contract against wb with batch landing on
    # the lane axis so the final store is lane-dense.
    logits = jnp.einsum("oh,bh->ob", wb_ref[...], h,
                        preferred_element_type=jnp.float32)         # (1, BBLK)
    out_ref[...] = jax.nn.sigmoid(logits + bb_ref[...])


# ---------------------------------------------------------------------------
# Host-side parameter folding (one-time weight transform)
# ---------------------------------------------------------------------------
def _fold_params(params):
    w1, b1 = params["w1"], params["b1"]            # (K1, Cin, OC), (OC,)
    w2, b2 = params["w2"], params["b2"]            # (K2, Cin, OC), (OC,)

    # Banded conv weight: W_band[(slab_pos, cin), (w, oc)] holds the tap that
    # multiplies input slab position `slab_pos` for output window position w.
    off = PADDING_2 - PADDING_1
    base1 = jnp.zeros((SLAB, N_INPUT, OUT_CHANNELS), jnp.float32)
    base1 = base1.at[off:off + KERNEL_1].set(w1)
    base2 = jnp.zeros((SLAB, N_INPUT, OUT_CHANNELS), jnp.float32)
    base2 = base2.at[:KERNEL_2].set(w2)
    band1 = jnp.stack([jnp.roll(base1, w, axis=0) for w in range(WIN)], axis=2)
    band2 = jnp.stack([jnp.roll(base2, w, axis=0) for w in range(WIN)], axis=2)
    wband = jnp.concatenate([band1, band2], axis=3).reshape(SLAB_FEAT, CONV_FEAT)
    bconv = jnp.tile(jnp.concatenate([b1, b2]), WIN).reshape(1, CONV_FEAT)

    # Fold eval-mode BatchNorm (y = x*s + t per channel) into the first Linear.
    s = params["bn_g"] * jax.lax.rsqrt(params["bn_v"] + BN_EPS)     # (C_TOTAL,)
    t = params["bn_b"] - params["bn_m"] * s
    wa, ba = params["wa"], params["ba"]                             # (FEAT, H), (H,)
    wa_scaled = wa.reshape(WIN, C_TOTAL, HIDDEN_1) * s[None, :, None]
    ba_f = (ba + jnp.tile(t, WIN) @ wa).reshape(1, HIDDEN_1)

    # x0 pass-through rows, expanded onto the 84 slab-feature rows.
    wx0 = jnp.zeros((SLAB, N_INPUT, HIDDEN_1), jnp.float32)
    wx0 = wx0.at[PADDING_2:PADDING_2 + WIN].set(wa_scaled[:, :N_INPUT, :])
    wx0 = wx0.reshape(SLAB_FEAT, HIDDEN_1)
    # conv-output rows, matching the (w, [conv1|conv2]) GEMM column layout.
    wy12 = wa_scaled[:, N_INPUT:, :].reshape(CONV_FEAT, HIDDEN_1)

    wb = params["wb"].reshape(HIDDEN_1, N_OUTPUT).T                 # (N_OUT, H)
    bb = params["bb"].reshape(N_OUTPUT, 1)                          # (N_OUT, 1)
    return wband, bconv, wx0, wy12, ba_f, wb, bb


def _round_up(v, m):
    return (v + m - 1) // m * m


# ---------------------------------------------------------------------------
# Wrapper
# ---------------------------------------------------------------------------
def cnn_rnn0_ffnn(x, params, block_b=512):
    """x: (B, L, N_INPUT) float32 -> (B, N_OUTPUT) float32 (eval mode)."""
    B, L, C = x.shape
    assert C == N_INPUT and L >= WIN

    # batch tiling: single block for small B, 512-row blocks (mult. of 128/8)
    # otherwise so blocked output stores stay lane-aligned.
    if B <= block_b:
        bblk = _round_up(max(B, 1), 8)
        b_pad = bblk
    else:
        bblk = _round_up(block_b, 128)
        b_pad = _round_up(B, bblk)
    nb = b_pad // bblk

    # Receptive-field slab of the 9 center positions (zero pad only as needed),
    # flattened (position, channel) -> (B_pad, 84).  Layout plumbing in JAX.
    mid = L // 2
    lo = mid - AA_WINDOW - PADDING_2
    hi = mid + AA_WINDOW + PADDING_2
    front, back = max(0, -lo), max(0, hi - (L - 1))
    x_slab = jnp.pad(x, ((0, b_pad - B), (front, back), (0, 0)))
    x_slab = x_slab[:, lo + front:hi + front + 1, :]
    x_rf = x_slab.reshape(b_pad, SLAB_FEAT)

    wband, bconv, wx0, wy12, ba_f, wb, bb = _fold_params(params)

    def full_spec(a):
        nd = a.ndim
        return pl.BlockSpec(a.shape, lambda i, _nd=nd: (0,) * _nd)

    out_row = pl.pallas_call(
        fused_kernel,
        out_shape=jax.ShapeDtypeStruct((N_OUTPUT, b_pad), jnp.float32),
        grid=(nb,),
        in_specs=[
            pl.BlockSpec((bblk, SLAB_FEAT), lambda i: (i, 0)),
            full_spec(wband), full_spec(bconv), full_spec(wx0),
            full_spec(wy12), full_spec(ba_f), full_spec(wb), full_spec(bb),
        ],
        out_specs=pl.BlockSpec((N_OUTPUT, bblk), lambda i: (0, i)),
        compiler_params=pltpu.CompilerParams(
            dimension_semantics=("parallel",)),
    )(x_rf, wband, bconv, wx0, wy12, ba_f, wb, bb)

    return out_row[:, :B].T                                         # (B, N_OUTPUT)


# ---------------------------------------------------------------------------
# Pure-JAX reference of the original PyTorch forward (eval mode) for checking.
# ---------------------------------------------------------------------------
def reference_forward(x, params):
    B, L, _ = x.shape

    def conv_nlc(xin, w, b, pad):
        K = w.shape[0]
        xp = jnp.pad(xin, ((0, 0), (pad, pad), (0, 0)))
        y = sum(jnp.einsum("blc,co->blo", xp[:, k:k + L, :], w[k])
                for k in range(K))
        return y + b[None, None, :]

    y1 = jax.nn.relu(conv_nlc(x, params["w1"], params["b1"], PADDING_1))
    y2 = jax.nn.relu(conv_nlc(x, params["w2"], params["b2"], PADDING_2))
    cat = jnp.concatenate([x, y1, y2], axis=-1)                     # (B, L, 20)
    s = params["bn_g"] * jax.lax.rsqrt(params["bn_v"] + BN_EPS)
    xb = (cat - params["bn_m"]) * s + params["bn_b"]
    mid = L // 2
    feat = xb[:, mid - AA_WINDOW:mid + AA_WINDOW + 1, :].reshape(B, FEAT)
    h = jax.nn.relu(feat @ params["wa"] + params["ba"])
    return jax.nn.sigmoid(h @ params["wb"] + params["bb"])


# ---------------------------------------------------------------------------
if __name__ == "__main__":
    key = jax.random.PRNGKey(0)
    ks = jax.random.split(key, 13)

    B = 2
    x = jax.random.normal(ks[0], (B, SEQ_LEN, N_INPUT), jnp.float32)

    params = dict(
        # Conv1d weights as (K, C_in, OC); torch (OC, C_in, K) -> transpose(2,1,0).
        w1=jax.random.normal(ks[1], (KERNEL_1, N_INPUT, OUT_CHANNELS), jnp.float32) * 0.1,
        b1=jax.random.normal(ks[2], (OUT_CHANNELS,), jnp.float32) * 0.1,
        w2=jax.random.normal(ks[3], (KERNEL_2, N_INPUT, OUT_CHANNELS), jnp.float32) * 0.1,
        b2=jax.random.normal(ks[4], (OUT_CHANNELS,), jnp.float32) * 0.1,
        # eval-mode BatchNorm1d parameters / running stats (non-trivial to
        # exercise the host-side fold)
        bn_g=1.0 + 0.1 * jax.random.normal(ks[9], (C_TOTAL,), jnp.float32),
        bn_b=0.1 * jax.random.normal(ks[10], (C_TOTAL,), jnp.float32),
        bn_m=0.1 * jax.random.normal(ks[11], (C_TOTAL,), jnp.float32),
        bn_v=0.5 + jnp.abs(jax.random.normal(ks[12], (C_TOTAL,), jnp.float32)),
        # Linear weights as (in_features, out_features); torch -> transpose.
        wa=jax.random.normal(ks[5], (FEAT, HIDDEN_1), jnp.float32) * 0.05,
        ba=jax.random.normal(ks[6], (HIDDEN_1,), jnp.float32) * 0.05,
        wb=jax.random.normal(ks[7], (HIDDEN_1, N_OUTPUT), jnp.float32) * 0.05,
        bb=jax.random.normal(ks[8], (N_OUTPUT,), jnp.float32) * 0.05,
    )
    # nn.Dropout layers are identity at inference time (no kernel work needed).

    fwd = jax.jit(cnn_rnn0_ffnn)
    out = jax.block_until_ready(fwd(x, params))
    ref = jax.block_until_ready(reference_forward(x, params))

    assert out.shape == (B, N_OUTPUT)
    assert bool(jnp.all(jnp.isfinite(out)))
    assert bool(jnp.all((out >= 0.0) & (out <= 1.0)))       # sigmoid range
    assert float(jnp.max(jnp.abs(out - ref))) < 5e-3        # matches module semantics
    print("KERNEL_OK")
</pallas_src>

<mosaic_0001>
module attributes {stable_mosaic.version = 11 : i64} {
  func.func @fused_kernel(%arg0: i32, %arg1: memref<8x84xf32, #tpu.memory_space<vmem>>, %arg2: memref<84x144xf32, #tpu.memory_space<vmem>>, %arg3: memref<1x144xf32, #tpu.memory_space<vmem>>, %arg4: memref<84x32xf32, #tpu.memory_space<vmem>>, %arg5: memref<144x32xf32, #tpu.memory_space<vmem>>, %arg6: memref<1x32xf32, #tpu.memory_space<vmem>>, %arg7: memref<1x32xf32, #tpu.memory_space<vmem>>, %arg8: memref<1x1xf32, #tpu.memory_space<vmem>>, %arg9: memref<1x8xf32, #tpu.memory_space<vmem>>) attributes {dimension_semantics = [#tpu.dimension_semantics<parallel>], iteration_bounds = array<i64: 1>, scalar_prefetch = 0 : i64, scratch_operands = 0 : i64, tpu.core_type = #tpu.core_type<tc>, window_params = [{transform_indices = @transform_0, window_bounds = array<i64: 8, 84>}, {pipeline_mode = #tpu.pipeline_mode<synchronous>, transform_indices = @transform_1, window_bounds = array<i64: 84, 144>}, {pipeline_mode = #tpu.pipeline_mode<synchronous>, transform_indices = @transform_2, window_bounds = array<i64: 1, 144>}, {pipeline_mode = #tpu.pipeline_mode<synchronous>, transform_indices = @transform_3, window_bounds = array<i64: 84, 32>}, {pipeline_mode = #tpu.pipeline_mode<synchronous>, transform_indices = @transform_4, window_bounds = array<i64: 144, 32>}, {pipeline_mode = #tpu.pipeline_mode<synchronous>, transform_indices = @transform_5, window_bounds = array<i64: 1, 32>}, {pipeline_mode = #tpu.pipeline_mode<synchronous>, transform_indices = @transform_6, window_bounds = array<i64: 1, 32>}, {pipeline_mode = #tpu.pipeline_mode<synchronous>, transform_indices = @transform_7, window_bounds = array<i64: 1, 1>}, {transform_indices = @transform_8, window_bounds = array<i64: 1, 8>}]} {
    %c0 = arith.constant 0 : index
    %c0_0 = arith.constant 0 : index
    %0 = vector.load %arg1[%c0, %c0_0] : memref<8x84xf32, #tpu.memory_space<vmem>>, vector<8x84xf32>
    %c0_1 = arith.constant 0 : index
    %c0_2 = arith.constant 0 : index
    %1 = vector.load %arg2[%c0_1, %c0_2] : memref<84x144xf32, #tpu.memory_space<vmem>>, vector<84x144xf32>
    %cst = arith.constant dense<0.000000e+00> : vector<8x144xf32>
    %2 = tpu.matmul %0, %1, %cst {dimension_numbers = #tpu.dot_dimension_numbers<[1], [0], [0], [1], [0, 0, 1, 1], [], []>} : vector<8x84xf32>, vector<84x144xf32>, vector<8x144xf32> -> vector<8x144xf32>
    %c0_3 = arith.constant 0 : index
    %c0_4 = arith.constant 0 : index
    %3 = vector.load %arg3[%c0_3, %c0_4] : memref<1x144xf32, #tpu.memory_space<vmem>>, vector<1x144xf32>
    %4 = vector.broadcast %3 : vector<1x144xf32> to vector<8x144xf32>
    %5 = arith.addf %2, %4 : vector<8x144xf32>
    %cst_5 = arith.constant 0.000000e+00 : f32
    %6 = vector.broadcast %cst_5 : f32 to vector<8x144xf32>
    %7 = arith.maximumf %5, %6 : vector<8x144xf32>
    %c0_6 = arith.constant 0 : index
    %c0_7 = arith.constant 0 : index
    %8 = vector.load %arg5[%c0_6, %c0_7] : memref<144x32xf32, #tpu.memory_space<vmem>>, vector<144x32xf32>
    %cst_8 = arith.constant dense<0.000000e+00> : vector<8x32xf32>
    %9 = tpu.matmul %7, %8, %cst_8 {dimension_numbers = #tpu.dot_dimension_numbers<[1], [0], [0], [1], [0, 0, 1, 1], [], []>} : vector<8x144xf32>, vector<144x32xf32>, vector<8x32xf32> -> vector<8x32xf32>
    %c0_9 = arith.constant 0 : index
    %c0_10 = arith.constant 0 : index
    %10 = vector.load %arg4[%c0_9, %c0_10] : memref<84x32xf32, #tpu.memory_space<vmem>>, vector<84x32xf32>
    %cst_11 = arith.constant dense<0.000000e+00> : vector<8x32xf32>
    %11 = tpu.matmul %0, %10, %cst_11 {dimension_numbers = #tpu.dot_dimension_numbers<[1], [0], [0], [1], [0, 0, 1, 1], [], []>} : vector<8x84xf32>, vector<84x32xf32>, vector<8x32xf32> -> vector<8x32xf32>
    %12 = arith.addf %9, %11 : vector<8x32xf32>
    %c0_12 = arith.constant 0 : index
    %c0_13 = arith.constant 0 : index
    %13 = vector.load %arg6[%c0_12, %c0_13] : memref<1x32xf32, #tpu.memory_space<vmem>>, vector<1x32xf32>
    %14 = vector.broadcast %13 : vector<1x32xf32> to vector<8x32xf32>
    %15 = arith.addf %12, %14 : vector<8x32xf32>
    %cst_14 = arith.constant 0.000000e+00 : f32
    %16 = vector.broadcast %cst_14 : f32 to vector<8x32xf32>
    %17 = arith.maximumf %15, %16 : vector<8x32xf32>
    %c0_15 = arith.constant 0 : index
    %c0_16 = arith.constant 0 : index
    %18 = vector.load %arg7[%c0_15, %c0_16] : memref<1x32xf32, #tpu.memory_space<vmem>>, vector<1x32xf32>
    "tpu.trace_start"() <{level = 10 : i32, message = "oh,bh->ob"}> : () -> ()
    %cst_17 = arith.constant dense<0.000000e+00> : vector<1x8xf32>
    %19 = tpu.matmul %18, %17, %cst_17 {dimension_numbers = #tpu.dot_dimension_numbers<[1], [1], [0], [0], [0, 0, 1, 0], [], []>} : vector<1x32xf32>, vector<8x32xf32>, vector<1x8xf32> -> vector<1x8xf32>
    "tpu.trace_stop"() : () -> ()
    %c0_18 = arith.constant 0 : index
    %c0_19 = arith.constant 0 : index
    %20 = vector.load %arg8[%c0_18, %c0_19] : memref<1x1xf32, #tpu.memory_space<vmem>>, vector<1x1xf32>
    %21 = vector.broadcast %20 : vector<1x1xf32> to vector<1x8xf32>
    %22 = arith.addf %19, %21 : vector<1x8xf32>
    %23 = arith.negf %22 : vector<1x8xf32>
    %24 = math.exp %23 : vector<1x8xf32>
    %cst_20 = arith.constant 1.000000e+00 : f32
    %25 = vector.broadcast %cst_20 : f32 to vector<1x8xf32>
    %26 = arith.addf %25, %24 : vector<1x8xf32>
    %27 = arith.divf %25, %26 : vector<1x8xf32>
    %c0_21 = arith.constant 0 : index
    %c0_22 = arith.constant 0 : index
    %28 = vector.load %arg9[%c0_21, %c0_22] : memref<1x8xf32, #tpu.memory_space<vmem>>, vector<1x8xf32>
    tpu.vector_store %arg9[%c0_21, %c0_22], %27 {strides = array<i32>} : memref<1x8xf32, #tpu.memory_space<vmem>>, vector<1x8xf32>,
    return
  }
  func.func @transform_0(%arg0: i32) -> (i32, i32) {
    %c0_i32 = arith.constant 0 : i32
    %c0_i32_0 = arith.constant 0 : i32
    return %arg0, %c0_i32 : i32, i32
  }
  func.func @transform_1(%arg0: i32) -> (i32, i32) {
    %c0_i32 = arith.constant 0 : i32
    %c0_i32_0 = arith.constant 0 : i32
    %c0_i32_1 = arith.constant 0 : i32
    return %c0_i32, %c0_i32_0 : i32, i32
  }
  func.func @transform_2(%arg0: i32) -> (i32, i32) {
    %c0_i32 = arith.constant 0 : i32
    %c0_i32_0 = arith.constant 0 : i32
    %c0_i32_1 = arith.constant 0 : i32
    return %c0_i32, %c0_i32_0 : i32, i32
  }
  func.func @transform_3(%arg0: i32) -> (i32, i32) {
    %c0_i32 = arith.constant 0 : i32
    %c0_i32_0 = arith.constant 0 : i32
    %c0_i32_1 = arith.constant 0 : i32
    return %c0_i32, %c0_i32_0 : i32, i32
  }
  func.func @transform_4(%arg0: i32) -> (i32, i32) {
    %c0_i32 = arith.constant 0 : i32
    %c0_i32_0 = arith.constant 0 : i32
    %c0_i32_1 = arith.constant 0 : i32
    return %c0_i32, %c0_i32_0 : i32, i32
  }
  func.func @transform_5(%arg0: i32) -> (i32, i32) {
    %c0_i32 = arith.constant 0 : i32
    %c0_i32_0 = arith.constant 0 : i32
    %c0_i32_1 = arith.constant 0 : i32
    return %c0_i32, %c0_i32_0 : i32, i32
  }
  func.func @transform_6(%arg0: i32) -> (i32, i32) {
    %c0_i32 = arith.constant 0 : i32
    %c0_i32_0 = arith.constant 0 : i32
    %c0_i32_1 = arith.constant 0 : i32
    return %c0_i32, %c0_i32_0 : i32, i32
  }
  func.func @transform_7(%arg0: i32) -> (i32, i32) {
    %c0_i32 = arith.constant 0 : i32
    %c0_i32_0 = arith.constant 0 : i32
    %c0_i32_1 = arith.constant 0 : i32
    return %c0_i32, %c0_i32_0 : i32, i32
  }
  func.func @transform_8(%arg0: i32) -> (i32, i32) {
    %c0_i32 = arith.constant 0 : i32
    %c0_i32_0 = arith.constant 0 : i32
    return %c0_i32, %arg0 : i32, i32
  }
}

</mosaic_0001>

<bundles_post_ra>
// kernel: tile.19
= control target key start
LH: loop header
LB: loop body
LE: loop exit
PB: predicated region body
PF: predicated region fallthrough
CT: control target
= control target key end

     0   :  { %vm9_vm0 = vcmask 64512   ;;  %s87_s10 = smov 80   ;;  %s88_s15 = smov 120   ;;  %vm3_vm1 = vcmask 162816   ;;  %vm13_vm2 = vcmask 97280   ;;  %vm16_vm3 = vcmask 1048512   ;;  %s138_s0 = inlined_call_operand.vmem [shape: f32[9,20], index: 0, kind: input, shape index: {}]   ;;  %s139_s1 = inlined_call_operand.vmem [shape: f32[180], index: 1, kind: output, shape index: {}]  }
   0x1   :  { %v73_v0 = vld [vmem:[%s138_s0 + $0x4] sm:$0x1]   ;;  %v70_v1 = vld [vmem:[%s138_s0 + $0x6] sm:$0x1]   ;;  %v74_v4 = vld [vmem:[%s138_s0 + $0x3] sm:$0x1]  }
   0x2   :  { %26 = vrot.lane.b32.xlu1 %v73_v0, %s87_s10  ;;  %v71_v2 = vld [vmem:[%s138_s0 + $0x6] sm:$0x1]   ;;  %v72_v5 = vld [vmem:[%s138_s0 + $0x5] sm:$0x1]   ;;  %s89_s18 = smov 60   ;;  %s90_s23 = smov 100  }
   0x3   :  { %v10_v3 = vsel %vm9_vm0, %v71_v2, %v70_v1  ;;  %v2_v6 = vld [vmem:[%s138_s0] sm:$0x1]   ;;  %v76_v7 = vld [vmem:[%s138_s0 + $0x8] sm:$0x1]   ;;  %v75_v8 = vld [vmem:[%s138_s0 + $0x2] sm:$0x1]  }
   0x4   :  { %11 = vrot.lane.b32.xlu0 %v10_v3, %s88_s15  ;;  %4 = vst.msk [vmem:[#allocation0] sm:$0x1] %vm3_vm1, %v2_v6   ;;  %s91_s26 = smov 32   ;;  %v78_v9 = vld [vmem:[%s138_s0 + $0x7] sm:$0x1]   ;;  %s92_s29 = smov 40  }
   0x5   :  { %v77_v10 = vld [vmem:[%s138_s0 + $0x1] sm:$0x1]   ;;  %s93_s0 = smov 12   ;;  %s94_s3 = smov 20   ;;  %vm22_vm4 = vcmask 982816   ;;  %vm28_vm5 = vcmask 818816  }
   0x6   :  { %32 = vrot.lane.b32.xlu1 %v74_v4, %s89_s18  ;;  %vm34_vm6 = vcmask 654816   ;;  %vm46_vm7 = vcmask 425216   ;;  %vm40_vm8 = vcmask 490816   ;;  %vm59_vm9 = vcmask 261216  }
   0x7   :  { %vm53_vm10 = vcmask 326816  }
   0x8   :  { %20 = vrot.lane.b32.xlu0 %v72_v5, %s90_s23 }
   0xa   :  { %44 = vrot.lane.b32.xlu1 %v76_v7, %s91_s26 }
   0xc   :  { %38 = vrot.lane.b32.xlu0 %v75_v8, %s92_s29 }
   0xe   :  { %57 = vrot.lane.b32.xlu1 %v78_v9, %s93_s0 }
  0x10   :  { %51 = vrot.lane.b32.xlu0 %v77_v10, %s94_s3 }
  0x74   :  { %v27_v11 = vpop.permute.xlu1 %26  }
  0x76   :  { %v12_v12 = vpop.permute.xlu0 %11  }
  0x77   :  { %15 = vst.msk [vmem:[#allocation0 + $0x1] sm:$0x1] %vm13_vm2, %v12_v12  }
  0x78   :  { %17 = vst.msk [vmem:[#allocation0] sm:$0x1] %vm16_vm3, %v12_v12   ;;  %v33_v13 = vpop.permute.xlu1 %32  }
  0x7a   :  { %v21_v14 = vpop.permute.xlu0 %20  }
  0x7b   :  { %23 = vst.msk [vmem:[#allocation0] sm:$0x1] %vm22_vm4, %v21_v14  }
  0x7c   :  { %29 = vst.msk [vmem:[#allocation0] sm:$0x1] %vm28_vm5, %v27_v11   ;;  %v45_v15 = vpop.permute.xlu1 %44  }
  0x7d   :  { %48 = vst.msk [vmem:[#allocation0 + $0x1] sm:$0x1] %vm46_vm7, %v45_v15  }
  0x7e   :  { %35 = vst.msk [vmem:[#allocation0] sm:$0x1] %vm34_vm6, %v33_v13   ;;  %v39_v16 = vpop.permute.xlu0 %38  }
  0x7f   :  { %41 = vst.msk [vmem:[#allocation0] sm:$0x1] %vm40_vm8, %v39_v16  }
  0x80   :  { %v58_v17 = vpop.permute.xlu1 %57  }
  0x81   :  { %61 = vst.msk [vmem:[#allocation0 + $0x1] sm:$0x1] %vm59_vm9, %v58_v17  }
  0x82   :  { %v52_v18 = vpop.permute.xlu0 %51  }
  0x83   :  { %54 = vst.msk [vmem:[#allocation0] sm:$0x1] %vm53_vm10, %v52_v18  }
  0x8a   :  { %v66_v19 = vld [vmem:[#allocation0] sm:$0x3] }
  0x8b   :  { %69 = vst [vmem:[%s139_s1] sm:$0x3] %v66_v19 }

// kernel: tile.18
= control target key start
LH: loop header
LB: loop body
LE: loop exit
PB: predicated region body
PF: predicated region fallthrough
CT: control target
= control target key end

     0   :  { %s28_s0 = inlined_call_operand.vmem [shape: f32[20], index: 0, kind: input, shape index: {}]   ;;  %s29_s1 = inlined_call_operand.vmem [shape: f32[9,20], index: 1, kind: output, shape index: {}]  }
   0x1   :  { %v4_v0 = vld [vmem:[%s28_s0] ss:$0 sm:$0xff] }
   0x2   :  { %5 = vst [vmem:[%s29_s1] sm:$0xff] %v4_v0  ;;  %8 = vst [vmem:[%s29_s1 + $0x8] sm:$0xff] %v4_v0 }

// kernel: tile.13
= control target key start
LH: loop header
LB: loop body
LE: loop exit
PB: predicated region body
PF: predicated region fallthrough
CT: control target
= control target key end

     0   :  { %s28_s0 = inlined_call_operand.vmem [shape: f32[16], index: 0, kind: input, shape index: {}]   ;;  %s29_s1 = inlined_call_operand.vmem [shape: f32[9,16], index: 1, kind: output, shape index: {}]  }
   0x1   :  { %v4_v0 = vld [vmem:[%s28_s0] ss:$0 sm:$0xff] }
   0x2   :  { %5 = vst [vmem:[%s29_s1] sm:$0xff] %v4_v0  ;;  %8 = vst [vmem:[%s29_s1 + $0x8] sm:$0xff] %v4_v0 }

// kernel: tile.14
= control target key start
LH: loop header
LB: loop body
LE: loop exit
PB: predicated region body
PF: predicated region fallthrough
CT: control target
= control target key end

     0   :  { %s77_s10 = smov 112   ;;  %s78_s11 = smov 80   ;;  %vm4_vm0 = vcmask 130048   ;;  %vm10_vm1 = vcmask 1048448   ;;  %vm16_vm2 = vcmask 917248   ;;  %vm22_vm3 = vcmask 786048   ;;  %s124_s0 = inlined_call_operand.vmem [shape: f32[9,16], index: 0, kind: input, shape index: {}]   ;;  %s125_s1 = inlined_call_operand.vmem [shape: f32[1,144], index: 1, kind: output, shape index: {}]  }
   0x1   :  { %v62_v0 = vld [vmem:[%s124_s0 + $0x7] sm:$0x1]   ;;  %v64_v1 = vld [vmem:[%s124_s0 + $0x5] sm:$0x1]   ;;  %v63_v2 = vld [vmem:[%s124_s0 + $0x6] sm:$0x1]  }
   0x2   :  { %8 = vrot.lane.b32.xlu0 %v62_v0, %s77_s10  ;;  %20 = vrot.lane.b32.xlu1 %v64_v1, %s78_s11  ;;  %v65_v3 = vld [vmem:[%s124_s0 + $0x4] sm:$0x1]   ;;  %s2_s16 = smov 3  ;;  %s79_s19 = smov 96   ;;  %v66_v5 = vld [vmem:[%s124_s0 + $0x3] sm:$0x1]  }
   0x3   :  { %v3_v4 = vld [vmem:[%s124_s0] ss:$8 sm:%s2_s16]   ;;  %s80_s20 = smov 64   ;;  %v67_v6 = vld [vmem:[%s124_s0 + $0x2] sm:$0x1]   ;;  %s81_s25 = smov 48  }
   0x4   :  { %5 = vst.msk [vmem:[#allocation0] ss:$8 sm:$0x3] %vm4_vm0, %v3_v4   ;;  %s82_s26 = smov 32   ;;  %v68_v7 = vld [vmem:[%s124_s0 + $0x1] sm:$0x1]  }
   0x5   :  { %s83_s0 = smov 16   ;;  %vm28_vm4 = vcmask 654848   ;;  %vm34_vm5 = vcmask 523648   ;;  %vm40_vm6 = vcmask 392448   ;;  %vm46_vm7 = vcmask 261248  }
   0x6   :  { %14 = vrot.lane.b32.xlu0 %v63_v2, %s79_s19  ;;  %26 = vrot.lane.b32.xlu1 %v65_v3, %s80_s20 }
   0xa   :  { %32 = vrot.lane.b32.xlu0 %v66_v5, %s81_s25  ;;  %38 = vrot.lane.b32.xlu1 %v67_v6, %s82_s26 }
   0xb   :  { %v57_v8 = vld [vmem:[#allocation0 + $0x8] sm:$0x1] }
   0xc   :  { %69 = vst [vmem:[%s125_s1 + $0x1] sm:$0x1] %v57_v8 }
   0xe   :  { %44 = vrot.lane.b32.xlu0 %v68_v7, %s83_s0 }
  0x74   :  { %v9_v9 = vpop.permute.xlu0 %8   ;;  %v21_v10 = vpop.permute.xlu1 %20  }
  0x75   :  { %11 = vst.msk [vmem:[#allocation0] sm:$0x1] %vm10_vm1, %v9_v9  }
  0x78   :  { %v15_v11 = vpop.permute.xlu0 %14   ;;  %v27_v12 = vpop.permute.xlu1 %26  }
  0x79   :  { %17 = vst.msk [vmem:[#allocation0] sm:$0x1] %vm16_vm2, %v15_v11  }
  0x7a   :  { %23 = vst.msk [vmem:[#allocation0] sm:$0x1] %vm22_vm3, %v21_v10  }
  0x7b   :  { %29 = vst.msk [vmem:[#allocation0] sm:$0x1] %vm28_vm4, %v27_v12  }
  0x7c   :  { %v33_v13 = vpop.permute.xlu0 %32   ;;  %v39_v14 = vpop.permute.xlu1 %38  }
  0x7d   :  { %35 = vst.msk [vmem:[#allocation0] sm:$0x1] %vm34_vm5, %v33_v13  }
  0x7e   :  { %41 = vst.msk [vmem:[#allocation0] sm:$0x1] %vm40_vm6, %v39_v14  }
  0x80   :  { %v45_v15 = vpop.permute.xlu0 %44  }
  0x81   :  { %47 = vst.msk [vmem:[#allocation0] sm:$0x1] %vm46_vm7, %v45_v15  }
  0x88   :  { %v52_v16 = vld [vmem:[#allocation0] sm:$0x1] }
  0x89   :  { %55 = vst [vmem:[%s125_s1] sm:$0x1] %v52_v16 }

// kernel: cnn_rnn0_ffnn.1
= control target key start
LH: loop header
LB: loop body
LE: loop exit
PB: predicated region body
PF: predicated region fallthrough
CT: control target
= control target key end

     0   :  { %vm70_vm0 = vcmask 1043456   ;;  %v497_v3 = vmov 0.0   ;;  %vm66_vm1 = vcmask 687104   ;;  %vm498_vm2 = vmmov 0   ;;  %s760_s1 = inlined_call_operand.vmem [shape: f32[84,144], index: 1, kind: input, shape index: {}]   ;;  %s761_s4 = inlined_call_operand.vmem [shape: f32[144,32], index: 4, kind: input, shape index: {}]   ;;  %s762_s0 = inlined_call_operand.vmem [shape: f32[8,84], index: 0, kind: input, shape index: {}]   ;;  %s763_s3 = inlined_call_operand.vmem [shape: f32[84,32], index: 3, kind: input, shape index: {}]   ;;  %s764_s2 = inlined_call_operand.vmem [shape: f32[1,144], index: 2, kind: input, shape index: {}]   ;;  %s765_s7 = inlined_call_operand.<no memory space> [shape: f32[1,1], index: 7, kind: input, shape index: {}]   ;;  %s766_s5 = inlined_call_operand.vmem [shape: f32[1,32], index: 5, kind: input, shape index: {}]   ;;  %s767_s6 = inlined_call_operand.vmem [shape: f32[1,32], index: 6, kind: input, shape index: {}]   ;;  %s768_s8 = inlined_call_operand.vmem [shape: f32[1,8], index: 8, kind: output, shape index: {}]  }
   0x1   :  { %v53_v0 = vld [vmem:[%s760_s1 + $0xa8] sm:$0xf]  ;;  %v52_v1 = vld [vmem:[%s760_s1 + $0xa0] sm:$0xf]  ;;  %v51_v2 = vld [vmem:[%s760_s1 + $0x98] sm:$0xff]  ;;  %141 = vmatprep.mubr.f32.mxu1 %v497_v3  ;;  %256 = vmatprep.subr.mxu0 %v497_v3  ;;  %v56_v53 = vlaneseq  ;;  %vm252_vm3 = vcmask 130048  }
   0x2   :  { %435 = vmatprep.subr.msk.mxu1 %vm70_vm0, %v53_v0  ;;  %v50_v4 = vld [vmem:[%s760_s1 + $0x90] sm:$0xff]  ;;  %v49_v5 = vld [vmem:[%s760_s1 + $0x88] sm:$0xff]  ;;  %v48_v6 = vld [vmem:[%s760_s1 + $0x80] sm:$0xff]  ;;  %vm346_vm4 = vcmask 261120   ;;  %vm429_vm5 = vcmask 57344  }
   0x3   :  { %436 = vmatpush1.msk.msra.mxu1 %vm70_vm0, %v52_v1  ;;  %v47_v7 = vld [vmem:[%s760_s1 + $0x78] sm:$0xff]  ;;  %v46_v8 = vld [vmem:[%s760_s1 + $0x70] sm:$0xff]  ;;  %v45_v9 = vld [vmem:[%s760_s1 + $0x68] sm:$0xff]  ;;  %v57_v54 = vshrl.u32 %v56_v53, 7 }
   0x4   :  { %89 = vmatprep.subr.mxu1 %v51_v2  ;;  %v44_v10 = vld [vmem:[%s760_s1 + $0x60] sm:$0xff]  ;;  %v165_v11 = vld [vmem:[%s761_s4 + $0x78] sm:$0xff]  ;;  %v164_v13 = vld [vmem:[%s761_s4 + $0x70] sm:$0xff] }
   0x5   :  { %90 = vmatpush1.msra.mxu1 %v50_v4  ;;  %v43_v12 = vld [vmem:[%s760_s1 + $0x58] sm:$0xff]  ;;  %257 = vmatpush1.msra.mxu0 %v165_v11  ;;  %v42_v14 = vld [vmem:[%s760_s1 + $0x50] sm:$0xff]  ;;  %v163_v15 = vld [vmem:[%s761_s4 + $0x68] sm:$0xff]  ;;  %v58_v55 = vsub.s32 0, %v57_v54  ;;  %v62_v57 = vsub.s32 1, %v57_v54 }
   0x6   :  { %91 = vmatprep.subr.mxu1 %v49_v5  ;;  %258 = vmatprep.subr.mxu0 %v497_v3  ;;  %v41_v16 = vld [vmem:[%s760_s1 + $0x48] sm:$0xff]  ;;  %v40_v17 = vld [vmem:[%s760_s1 + $0x40] sm:$0xff]  ;;  %v39_v19 = vld [vmem:[%s760_s1 + $0x38] sm:$0xff]  ;;  %v499_v5 = vmov 0  }
   0x7   :  { %92 = vmatpush1.msra.mxu1 %v48_v6  ;;  %259 = vmatpush1.msra.mxu0 %v164_v13  ;;  %v162_v18 = vld [vmem:[%s761_s4 + $0x60] sm:$0xff]  ;;  %v38_v20 = vld [vmem:[%s760_s1 + $0x30] sm:$0xff]  ;;  %v161_v21 = vld [vmem:[%s761_s4 + $0x58] sm:$0xff]  ;;  %v13_v6 = vstv %s765_s7 }
   0x8   :  { %93 = vmatprep.subr.mxu1 %v47_v7  ;;  %260 = vmatprep.subr.mxu0 %v497_v3  ;;  %v37_v22 = vld [vmem:[%s760_s1 + $0x28] sm:$0xff]  ;;  %v36_v23 = vld [vmem:[%s760_s1 + $0x20] sm:$0xff]  ;;  %v160_v24 = vld [vmem:[%s761_s4 + $0x50] sm:$0xff]  ;;  %14 = vst [vmem:[#allocation2] sm:$0x1] %v13_v6 }
   0x9   :  { %94 = vmatpush1.msra.mxu1 %v46_v8  ;;  %261 = vmatpush1.msra.mxu0 %v163_v15  ;;  %v35_v25 = vld [vmem:[%s760_s1 + $0x18] sm:$0xff]  ;;  %v34_v26 = vld [vmem:[%s760_s1 + $0x10] sm:$0xff]  ;;  %v159_v27 = vld [vmem:[%s761_s4 + $0x48] sm:$0xff] }
   0xa   :  { %95 = vmatprep.subr.mxu1 %v45_v9  ;;  %262 = vmatprep.subr.mxu0 %v497_v3  ;;  %v33_v28 = vld [vmem:[%s760_s1 + $0x8] sm:$0xff]  ;;  %v32_v29 = vld [vmem:[%s760_s1] sm:$0xff]  ;;  %v178_v32 = vld [vmem:[%s763_s3 + $0x50] sm:$0xf] }
   0xb   :  { %96 = vmatpush1.msra.mxu1 %v44_v10  ;;  %263 = vmatpush1.msra.mxu0 %v162_v18  ;;  %v158_v30 = vld [vmem:[%s761_s4 + $0x40] sm:$0xff]  ;;  %v157_v33 = vld [vmem:[%s761_s4 + $0x38] sm:$0xff]  ;;  %v177_v34 = vld [vmem:[%s763_s3 + $0x48] sm:$0xff] }
   0xc   :  { %97 = vmatprep.subr.mxu1 %v43_v12  ;;  %264 = vmatprep.subr.mxu0 %v497_v3  ;;  %v648_v31 = vld [vmem:[%s762_s0] sm:$0xff]  ;;  %v156_v35 = vld [vmem:[%s761_s4 + $0x30] sm:$0xff]  ;;  %v155_v37 = vld [vmem:[%s761_s4 + $0x28] sm:$0xff] }
   0xd   :  { %98 = vmatpush1.msra.mxu1 %v42_v14  ;;  %265 = vmatpush1.msra.mxu0 %v161_v21  ;;  %v176_v36 = vld [vmem:[%s763_s3 + $0x40] sm:$0xff]  ;;  %v175_v38 = vld [vmem:[%s763_s3 + $0x38] sm:$0xff]  ;;  %v174_v40 = vld [vmem:[%s763_s3 + $0x30] sm:$0xff] }
   0xe   :  { %99 = vmatprep.subr.mxu1 %v41_v16  ;;  %266 = vmatprep.subr.mxu0 %v497_v3  ;;  %v154_v39 = vld [vmem:[%s761_s4 + $0x20] sm:$0xff]  ;;  %v153_v41 = vld [vmem:[%s761_s4 + $0x18] sm:$0xff]  ;;  %v173_v42 = vld [vmem:[%s763_s3 + $0x28] sm:$0xff] }
   0xf   :  { %100 = vmatpush1.msra.mxu1 %v40_v17  ;;  %267 = vmatpush1.msra.mxu0 %v160_v24  ;;  %v152_v43 = vld [vmem:[%s761_s4 + $0x10] sm:$0xff]  ;;  %v172_v44 = vld [vmem:[%s763_s3 + $0x20] sm:$0xff]  ;;  %v171_v45 = vld [vmem:[%s763_s3 + $0x18] sm:$0xff] }
  0x10   :  { %101 = vmatprep.subr.mxu1 %v39_v19  ;;  %268 = vmatprep.subr.mxu0 %v497_v3  ;;  %v170_v46 = vld [vmem:[%s763_s3 + $0x10] sm:$0xff]  ;;  %v151_v47 = vld [vmem:[%s761_s4 + $0x8] sm:$0xff]  ;;  %v150_v49 = vld [vmem:[%s761_s4] sm:$0xff] }
  0x11   :  { %102 = vmatpush1.msra.mxu1 %v38_v20  ;;  %269 = vmatpush1.msra.mxu0 %v159_v27  ;;  %v169_v48 = vld [vmem:[%s763_s3 + $0x8] sm:$0xff]  ;;  %v168_v50 = vld [vmem:[%s763_s3] sm:$0xff] }
  0x12   :  { %103 = vmatprep.subr.mxu1 %v37_v22  ;;  %270 = vmatprep.subr.mxu0 %v497_v3  ;;  %v167_v51 = vld [vmem:[%s761_s4 + $0x88] sm:$0xff]  ;;  %v166_v52 = vld [vmem:[%s761_s4 + $0x80] sm:$0xff] }
  0x13   :  { %104 = vmatpush1.msra.mxu1 %v36_v23  ;;  %271 = vmatpush1.msra.mxu0 %v158_v30  ;;  %v54_v56 = vld [vmem:[%s764_s2] sm:$0x3] }
  0x14   :  { %105 = vmatprep.subr.mxu1 %v35_v25  ;;  %272 = vmatprep.subr.mxu0 %v497_v3  ;;  %v59_v58 = vrot.slane %v54_v56, %v58_v55  ;;  %v63_v59 = vrot.slane %v54_v56, %v62_v57  ;;  %v336_v7 = vld [vmem:[#allocation2] sm:$0x1] }
  0x15   :  { %106 = vmatpush1.msra.mxu1 %v34_v26  ;;  %273 = vmatpush1.msra.mxu0 %v157_v33  ;;  %v441_v9 = vld [vmem:[%s766_s5] ss:$0 sm:$0xff] }
  0x16   :  { %107 = vmatprep.subr.mxu1 %v33_v28  ;;  %274 = vmatprep.subr.mxu0 %v497_v3  ;;  %v335_v13 = vld [vmem:[%s767_s6] sm:$0x1] }
  0x17   :  { %108 = vmatpush1.msra.mxu1 %v32_v29  ;;  %275 = vmatpush1.msra.mxu0 %v156_v35 }
  0x18   :  { %437 = vmatmul.mubr.msk.f32.vlgmr.msra.gmra.mxu1 %vm66_vm1, %v648_v31  ;;  %459 = vmatprep.subr.mxu1 %v497_v3 }
  0x19   :  { %460 = vmatpush3.msk.msra.mxu1 %vm70_vm0, %v178_v32  ;;  %276 = vmatprep.subr.mxu0 %v497_v3 }
  0x1a   :  { %461 = vmatprep.subr.mxu1 %v497_v3  ;;  %277 = vmatpush1.msra.mxu0 %v155_v37 }
  0x1b   :  { %462 = vmatpush3.msra.mxu1 %v177_v34  ;;  %278 = vmatprep.subr.mxu0 %v497_v3 }
  0x1c   :  { %463 = vmatprep.subr.mxu1 %v497_v3  ;;  %279 = vmatpush1.msra.mxu0 %v154_v39 }
  0x1d   :  { %464 = vmatpush3.msra.mxu1 %v176_v36  ;;  %280 = vmatprep.subr.mxu0 %v497_v3 }
  0x1e   :  { %465 = vmatprep.subr.mxu1 %v497_v3  ;;  %281 = vmatpush1.msra.mxu0 %v153_v41 }
  0x1f   :  { %466 = vmatpush3.msra.mxu1 %v175_v38  ;;  %282 = vmatprep.subr.mxu0 %v497_v3 }
  0x20   :  { %467 = vmatprep.subr.mxu1 %v497_v3  ;;  %283 = vmatpush1.msra.mxu0 %v152_v43 }
  0x21   :  { %468 = vmatpush3.msra.mxu1 %v174_v40  ;;  %284 = vmatprep.subr.mxu0 %v497_v3 }
  0x22   :  { %469 = vmatprep.subr.mxu1 %v497_v3  ;;  %285 = vmatpush1.msra.mxu0 %v151_v47 }
  0x23   :  { %470 = vmatpush3.msra.mxu1 %v173_v42  ;;  %286 = vmatprep.subr.mxu0 %v497_v3 }
  0x24   :  { %471 = vmatprep.subr.mxu1 %v497_v3  ;;  %287 = vmatpush1.msra.mxu0 %v150_v49 }
  0x25   :  { %472 = vmatpush3.msra.mxu1 %v172_v44  ;;  %316 = vmatprep.subr.mxu0 %v497_v3 }
  0x26   :  { %473 = vmatprep.subr.mxu1 %v497_v3  ;;  %481 = vmatprep.mubr.msk.f32.mxu1 %vm498_vm2, %v497_v3 }
  0x27   :  { %474 = vmatpush3.msra.mxu1 %v171_v45  ;;  %317 = vmatpush2.msra.mxu0 %v167_v51 }
  0x28   :  { %475 = vmatprep.subr.mxu1 %v497_v3  ;;  %318 = vmatprep.subr.mxu0 %v497_v3 }
  0x29   :  { %476 = vmatpush3.msra.mxu1 %v170_v46  ;;  %319 = vmatpush2.msra.mxu0 %v166_v52 }
  0x2a   :  { %477 = vmatprep.subr.mxu1 %v497_v3  ;;  %484 = vmatprep.subr.mxu0 %v497_v3 }
  0x2b   :  { %478 = vmatpush3.msra.mxu1 %v169_v48  ;;  %492 = vset.pattern.permute.xlu0 %v499_v5 }
  0x2c   :  { %479 = vmatprep.subr.mxu1 %v497_v3  ;;  %339 = vperm.xlu0 %492, %v336_v7  }
  0x2d   :  { %480 = vmatpush3.msra.mxu1 %v168_v50 }
  0x2e   :  { %482 = vmatmul.mubr.msk.f32.vlgmr.msra.gmra.mxu1 %vm66_vm1, %v648_v31 }
  0xa7   :  { %v340_v14 = vpop.permute.xlu0 %339 }
  0xa8   :  { %v345_v15 = vrot.slane %v340_v14, %v58_v55 }
  0xd8   :  { %v143_v60 = vpop.f32.mrf.mxu1 }
  0xd9   :  { %v144_v61 = vadd.f32 %v143_v60, %v59_v58 }
  0xda   :  { %v145_v62 = vpop.f32.mrf.mxu1 }
  0xdb   :  { %v146_v63 = vadd.f32 %v145_v62, %v63_v59  ;;  %v148_v1 = vmax.f32 %v144_v61, 0.0 }
  0xdd   :  { %v149_v0 = vmax.f32 %v146_v63, 0.0 }
  0xdf   :  { %440 = vmatprep.mubr.msk.f32.mxu0 %vm252_vm3, %v149_v0 }
  0xe0   :  { %321 = vmatmul.mubr.f32.vlgmr.msra.gmra.mxu0 %v148_v1 }
  0xe1   :  { %486 = vmatprep.mubr.msk.f32.mxu0 %vm498_vm2, %v497_v3 }
  0xee   :  { %v248_v2 = vpop.f32.mrf.mxu1 }
  0xf0   :  { %v483_v4 = vpop.f32.mrf.mxu1 }
 0x1a0   :  { %v322_v8 = vpop.f32.mrf.mxu0 }
 0x1a1   :  { %v323_v10 = vadd.f32 %v322_v8, %v248_v2 }
 0x1a2   :  { %v324_v11 = vpop.f32.mrf.mxu0 }
 0x1a3   :  { %v333_v12 = vadd.f32 %v441_v9, %v323_v10 }
 0x1a5   :  { %v334_v3 = vmax.f32 %v333_v12, 0.0 }
 0x1a7   :  { %485 = vmatpush3.xpose.msk.msra.mxu0 %vm346_vm4, %v334_v3 }
 0x1aa   :  { %487 = vmatmul.mubr.msk.f32.vlgmr.msra.gmra.mxu0 %vm346_vm4, %v335_v13 }
 0x26a   :  { %v419_v16 = vpop.f32.mrf.mxu0 }
 0x26b   :  { %v420_v17 = vadd.f32 %v419_v16, %v345_v15 }
 0x26c   :  { %v488_v18 = vpop.f32.mrf.mxu0 }
 0x26d   :  { %v444_v19 = vmul.f32 -1.442695, %v420_v17 }
 0x26f   :  { %493 = vpow2.f32 %v444_v19 }
 0x27c   :  { %v494_v20 = vpop.eup %493 }
 0x27d   :  { %v426_v21 = vadd.f32 1.0, %v494_v20 }
 0x27f   :  { %495 = vrcp.f32 %v426_v21 }
 0x28c   :  { %v496_v22 = vpop.eup %495 }
 0x28d   :  { %430 = vst.msk [vmem:[%s768_s8] sm:$0x1] %vm429_vm5, %v496_v22 }

</bundles_post_ra>
